<compile_context>
chip_gen: v7x
topology: tpu7x:2x2x1
jax: 0.10.0
libtpu: 0.0.40
codegen_flags: <defaults>
</compile_context>

<pallas_src>
import numpy as np
import jax
import jax.numpy as jnp
from jax.experimental import pallas as pl
from jax.experimental.pallas import tpu as pltpu


def _round_up(a: int, b: int) -> int:
    return ((a + b - 1) // b) * b


def _stacked_shifted_dft_matrix(H: int) -> jax.Array:
    """(2H, H) matrix [cos; sin] of the DFT with fftshift baked into the row order."""
    n = np.arange(H)
    k = np.arange(H)
    # fftshift(y)[k] == y[(k - H//2) % H]  -> permute DFT rows accordingly.
    k_shifted = (k - (H // 2)) % H
    angle = -2.0 * np.pi * np.outer(k_shifted, n) / H            # (H, H)
    stacked = np.concatenate([np.cos(angle), np.sin(angle)], axis=0)  # (2H, H)
    return jnp.asarray(stacked.astype(np.float32))


def _doppler_kernel(w_ref, x_ref, o_ref):
    # w_ref: (2H, H)   stacked [cos; sin] shifted DFT matrix (shared across grid)
    # x_ref: (H, NT)   lane-dense input tile  (NT lanes = many (b,c,w) columns)
    # o_ref: (H, NT)   lane-dense output tile
    H = o_ref.shape[0]
    y = jnp.dot(w_ref[...], x_ref[...], preferred_element_type=jnp.float32)  # (2H, NT)
    re = y[:H]
    im = y[H:]
    o_ref[...] = jnp.sqrt(re * re + im * im)


def doppler_map_one_sample(x: jax.Array) -> jax.Array:
    """abs(fftshift(fft(x, axis=2), axes=2)) for real x of shape (B, C, H, W)."""
    assert x.ndim == 4
    B, C, H, W = x.shape
    N = B * C * W

    # Lane-dense layout: (B, C, H, W) -> (H, B*C*W).
    x_t = jnp.transpose(x, (2, 0, 1, 3)).reshape(H, N).astype(jnp.float32)

    # Tile the lane dimension: at least 128 lanes, at most 512 per grid step.
    n_tile = 512 if N >= 512 else _round_up(max(N, 1), 128)
    n_pad = _round_up(N, n_tile)
    if n_pad != N:
        x_t = jnp.pad(x_t, ((0, 0), (0, n_pad - N)))

    w = _stacked_shifted_dft_matrix(H)  # (2H, H)

    # VMEM budget (double-buffered in/out tiles + shared matrix + temporaries).
    bytes_needed = (
        2 * (2 * H * H * 4)           # stacked DFT matrix (double-buffered)
        + 2 * 2 * (H * n_tile * 4)    # in + out tiles (double-buffered)
        + 4 * H * n_tile * 4          # (2H, NT) matmul result + temporaries
    )
    compiler_kwargs = dict(dimension_semantics=("parallel",))
    if bytes_needed > 12 * 1024 * 1024:
        # Raise the scoped-VMEM limit only when the tiles actually need it
        # (defaults: 16 MiB v5e / 32 MiB v6e+v7x), capped well below v7x physical.
        compiler_kwargs["vmem_limit_bytes"] = min(48 * 1024 * 1024,
                                                  int(bytes_needed * 2))

    out_pad = pl.pallas_call(
        _doppler_kernel,
        out_shape=jax.ShapeDtypeStruct((H, n_pad), jnp.float32),
        grid_spec=pltpu.PrefetchScalarGridSpec(
            num_scalar_prefetch=0,
            grid=(n_pad // n_tile,),
            in_specs=[
                pl.BlockSpec((2 * H, H), lambda i: (0, 0)),    # shared [cos; sin]
                pl.BlockSpec((H, n_tile), lambda i: (0, i)),   # lane-dense x tile
            ],
            out_specs=pl.BlockSpec((H, n_tile), lambda i: (0, i)),
        ),
        compiler_params=pltpu.CompilerParams(**compiler_kwargs),
    )(w, x_t)

    # Undo padding and restore the (B, C, H, W) layout.
    out = out_pad[:, :N].reshape(H, B, C, W)
    return jnp.transpose(out, (1, 2, 0, 3))


if __name__ == "__main__":
    key = jax.random.PRNGKey(0)
    B, C, H, W = 2, 4, 16, 16
    x = jax.random.normal(key, (B, C, H, W), dtype=jnp.float32)

    out = doppler_map_one_sample(x)
    out = jax.block_until_ready(out)

    # Reference: same semantics as torch.abs(torch.fft.fftshift(torch.fft.fft(x, dim=2), dim=2))
    x_np = np.asarray(x)
    ref = np.abs(np.fft.fftshift(np.fft.fft(x_np, axis=2), axes=2)).astype(np.float32)
    np.testing.assert_allclose(np.asarray(out), ref, rtol=1e-4, atol=1e-4)

    print("KERNEL_OK")
</pallas_src>

<mosaic_0001>
module attributes {stable_mosaic.version = 11 : i64} {
  func.func @_doppler_kernel(%arg0: i32, %arg1: memref<32x16xf32, #tpu.memory_space<vmem>>, %arg2: memref<16x128xf32, #tpu.memory_space<vmem>>, %arg3: memref<16x128xf32, #tpu.memory_space<vmem>>) attributes {dimension_semantics = [#tpu.dimension_semantics<parallel>], iteration_bounds = array<i64: 1>, scalar_prefetch = 0 : i64, scratch_operands = 0 : i64, tpu.core_type = #tpu.core_type<tc>, window_params = [{pipeline_mode = #tpu.pipeline_mode<synchronous>, transform_indices = @transform_0, window_bounds = array<i64: 32, 16>}, {transform_indices = @transform_1, window_bounds = array<i64: 16, 128>}, {transform_indices = @transform_2, window_bounds = array<i64: 16, 128>}]} {
    %c0 = arith.constant 0 : index
    %c0_0 = arith.constant 0 : index
    %0 = vector.load %arg1[%c0, %c0_0] : memref<32x16xf32, #tpu.memory_space<vmem>>, vector<32x16xf32>
    %c0_1 = arith.constant 0 : index
    %c0_2 = arith.constant 0 : index
    %1 = vector.load %arg2[%c0_1, %c0_2] : memref<16x128xf32, #tpu.memory_space<vmem>>, vector<16x128xf32>
    %cst = arith.constant dense<0.000000e+00> : vector<32x128xf32>
    %2 = tpu.matmul %0, %1, %cst {dimension_numbers = #tpu.dot_dimension_numbers<[1], [0], [0], [1], [0, 0, 1, 1], [], []>} : vector<32x16xf32>, vector<16x128xf32>, vector<32x128xf32> -> vector<32x128xf32>
    %3 = vector.extract_strided_slice %2 {offsets = [0, 0], sizes = [16, 128], strides = [1, 1]} : vector<32x128xf32> to vector<16x128xf32>
    %4 = vector.extract_strided_slice %2 {offsets = [16, 0], sizes = [16, 128], strides = [1, 1]} : vector<32x128xf32> to vector<16x128xf32>
    %5 = arith.mulf %3, %3 : vector<16x128xf32>
    %6 = arith.mulf %4, %4 : vector<16x128xf32>
    %7 = arith.addf %5, %6 : vector<16x128xf32>
    %8 = math.sqrt %7 : vector<16x128xf32>
    %c0_3 = arith.constant 0 : index
    %c0_4 = arith.constant 0 : index
    %9 = vector.load %arg3[%c0_3, %c0_4] : memref<16x128xf32, #tpu.memory_space<vmem>>, vector<16x128xf32>
    tpu.vector_store %arg3[%c0_3, %c0_4], %8 {strides = array<i32>} : memref<16x128xf32, #tpu.memory_space<vmem>>, vector<16x128xf32>,
    return
  }
  func.func @transform_0(%arg0: i32) -> (i32, i32) {
    %c0_i32 = arith.constant 0 : i32
    %c0_i32_0 = arith.constant 0 : i32
    %c0_i32_1 = arith.constant 0 : i32
    return %c0_i32, %c0_i32_0 : i32, i32
  }
  func.func @transform_1(%arg0: i32) -> (i32, i32) {
    %c0_i32 = arith.constant 0 : i32
    %c0_i32_0 = arith.constant 0 : i32
    return %c0_i32, %arg0 : i32, i32
  }
  func.func @transform_2(%arg0: i32) -> (i32, i32) {
    %c0_i32 = arith.constant 0 : i32
    %c0_i32_0 = arith.constant 0 : i32
    return %c0_i32, %arg0 : i32, i32
  }
}

</mosaic_0001>

<bundles_post_ra>
// kernel: tpu_custom_call.1
= control target key start
LH: loop header
LB: loop body
LE: loop exit
PB: predicated region body
PF: predicated region fallthrough
CT: control target
= control target key end

     0   :  { %vm18_vm0 = vcmask 130048   ;;  %s259_s0 = inlined_call_operand.vmem [shape: f32[32,16], index: 0, kind: input, shape index: {}]   ;;  %s260_s1 = inlined_call_operand.vmem [shape: f32[16,128], index: 1, kind: input, shape index: {}]   ;;  %s261_s2 = inlined_call_operand.hbm [shape: f32[16,128], index: 2, kind: output, shape index: {}]  }
   0x1   :  { %v16_v0 = vld [vmem:[%s260_s1] sm:$0xff]  ;;  %v17_v1 = vld [vmem:[%s260_s1 + $0x8] sm:$0xff]  ;;  %v14_v4 = vld [vmem:[%s259_s0 + $0x10] sm:$0xff] }
   0x2   :  { %v12_v2 = vld [vmem:[%s259_s0] sm:$0xff]  ;;  %v174_v3 = vpack.c.bf16 %v17_v1, %v16_v0  ;;  %171 = vmatprep.mubr.msk.f32.mxu1 %vm18_vm0, %v14_v4 }
   0x3   :  { %168 = vmatprep.mubr.msk.f32.mxu0 %vm18_vm0, %v12_v2 }
   0x4   :  { %7 = vsyncpa [#allocation3], 0  ;;  %175 = vmatprep.subr.bf16.mxu0 %v174_v3  ;;  %178 = vmatprep.subr.bf16.mxu1 %v174_v3  ;;  %v13_v5 = vld [vmem:[%s259_s0 + $0x8] sm:$0xff]  ;;  %v15_v6 = vld [vmem:[%s259_s0 + $0x18] sm:$0xff]  ;;  %s211_s20 = smov [#allocation2]  }
   0x5   :  { %177 = vmatpush3.bf16.msra.mxu0 %v174_v3  ;;  %179 = vmatpush3.bf16.msra.mxu1 %v174_v3  ;;  %s143_s21 = sshll.u32 %s211_s20, 4  ;;  %s144_s21 = int_to_ptr.vmem [resolvable:$true] %s143_s21 }
   0x6   :  { %s187_s0 = scalar_lea.vmem %s144_s21, 256  ;;  %p192_p1 = scmp.lt.s32.totalorder %s144_s21, %s144_s21 }
   0x7   :  { %p188_p0 = scmp.ne.s32.totalorder %s144_s21, %s187_s0  ;;  %p193_p2 = scmp.lt.s32.totalorder %s187_s0, %s187_s0 }
   0x8   :  { %169 = vmatmul.mubr.msk.f32.vlgmr.msra.gmra.mrb[0].mxu0 %vm18_vm0, %v13_v5  ;;  %172 = vmatmul.mubr.msk.f32.vlgmr.msra.gmra.mrb[0].mxu1 %vm18_vm0, %v15_v6 }
   0x9   :  { %p194_p3 = por %p193_p2, %p192_p1 }
   0xb   :  { %p195_p4 = pnand %p194_p3, %p188_p0 }
  0xdb   :  { %v170_v7 = vpop.f32.mrb[0].mxu0  ;;  %v173_v8 = vpop.f32.mrb[0].mxu1 }
  0xdc   :  { %v117_v9 = vmul.f32 %v170_v7, %v170_v7  ;;  %v119_v10 = vmul.f32 %v173_v8, %v173_v8  ;;  %v97_v11 = vpop.f32.mrb[1].mxu0  ;;  %v107_v12 = vpop.f32.mrb[1].mxu1 }
  0xdd   :  { %v116_v13 = vmul.f32 %v97_v11, %v97_v11  ;;  %v118_v14 = vmul.f32 %v107_v12, %v107_v12 }
  0xde   :  { %v121_v15 = vadd.f32 %v119_v10, %v117_v9 }
  0xdf   :  { %v120_v16 = vadd.f32 %v118_v14, %v116_v13 }
  0xe0   :  { %183 = vrsqrt.f32 %v121_v15  ;;  %vm131_vm1 = vcmp.eq.f32.partialorder %v121_v15, inf  ;;  %v134_v21 = vand.u32 2147483648, %v121_v15  ;;  %vm133_vm3 = vcmp.eq.f32.partialorder %v121_v15, 0.0 }
  0xe1   :  { %185 = vrsqrt.f32 %v120_v16  ;;  %vm124_vm2 = vcmp.eq.f32.partialorder %v120_v16, inf  ;;  %v127_v22 = vand.u32 2147483648, %v120_v16  ;;  %vm126_vm4 = vcmp.eq.f32.partialorder %v120_v16, 0.0 }
  0xea   :  { %v184_v17 = vpop.eup %183 }
  0xeb   :  { %v186_v18 = vpop.eup %185  ;;  %v130_v19 = vmul.f32 %v184_v17, %v121_v15 }
  0xec   :  { %v123_v20 = vmul.f32 %v186_v18, %v120_v16 }
  0xed   :  { %v132_v23 = vsel %vm131_vm1, %v121_v15, %v130_v19 }
  0xee   :  { %v125_v24 = vsel %vm124_vm2, %v120_v16, %v123_v20  ;;  %v135_v25 = vsel %vm133_vm3, %v134_v21, %v132_v23 }
  0xef   :  { %v128_v26 = vsel %vm126_vm4, %v127_v22, %v125_v24  ;;  %137 = vst [vmem:[#allocation2 + $0x8] sm:$0xff] %v135_v25 }
  0xf0   :  { %136 = vst [vmem:[#allocation2] sm:$0xff] %v128_v26 }
  0xf1   :  { %198 = shalt.err (!%p195_p4)
}
  0xf2   :  { %s199_s24 = scalar_lea.hbm %s261_s2, 256 }
  0xf3   :  { %p200_p5 = scmp.ne.s32.totalorder %s261_s2, %s199_s24  ;;  %p203_p6 = scmp.lt.u32.totalorder %s199_s24, %s261_s2 }
  0xf5   :  { %p205_p7 = pnand %p203_p6, %p200_p5 }
  0xf7   :  { %208 = shalt.err (!%p205_p7)
}
  0xf8   :  { %s212_s29 = smov 128   ;;  %s213_s30 = smov 8  }
  0xf9   :  { %149 = dma.vmem_to_hbm [thread:$0]  %s144_s21, 256, %s261_s2, [#allocation3], %s212_s29, %s212_s29, %s213_s30  }
  0xfa   :  { %209 = dma.done.wait [#allocation3], 256  }
  0xfb   :  { %210 = vsyncadd [#allocation3], 4294967040 }
  0xfc   :  { %153 = vsyncpa [#allocation3], 1 }

</bundles_post_ra>
